<compile_context>
chip_gen: v5e
topology: v5e:2x2
jax: 0.10.0
libtpu: 0.0.40
codegen_flags: <defaults>
</compile_context>

<pallas_src>
import jax
import jax.numpy as jnp
from jax.experimental import pallas as pl
from jax.experimental.pallas import tpu as pltpu


def _round_up(v, m):
    return (v + m - 1) // m * m


def _cdiv(a, b):
    return -(-a // b)


# --------------------------- hardware / probes --------------------------------

def _vmem_capacity_bytes():
    """Physical VMEM per TensorCore; conservative fallback if unavailable."""
    try:
        info = pltpu.get_tpu_info()
        for name in ("vmem_capacity_bytes", "vmem_bytes", "vmem_size_bytes"):
            cap = getattr(info, name, None)
            if cap:
                return int(cap)
    except Exception:
        pass
    return 64 * 1024 * 1024  # v7x per-TC VMEM (smallest of v5e/v6e/v7x)


_ROLL_IS_NUMPY_CONVENTION = None


def _right_shift_amount(size):
    """Static shift s.t. pltpu.roll(x, shift, axis=-1)[..., t] == x[..., t-1].

    pltpu.roll follows np.roll semantics; a one-off 8x128 probe pins the
    rotation direction so the conv tap can never be silently built backwards.
    """
    global _ROLL_IS_NUMPY_CONVENTION
    if _ROLL_IS_NUMPY_CONVENTION is None:
        def probe(x_ref, o_ref):
            o_ref[...] = pltpu.roll(x_ref[...], 1, 1)

        x = jnp.broadcast_to(jnp.arange(128, dtype=jnp.float32), (8, 128))
        y = pl.pallas_call(
            probe, out_shape=jax.ShapeDtypeStruct((8, 128), jnp.float32))(x)
        _ROLL_IS_NUMPY_CONVENTION = bool(jax.device_get(y)[0, 0] == 127.0)
    return 1 if _ROLL_IS_NUMPY_CONVENTION else size - 1


# ------------------------------ tiling ----------------------------------------

def _select_tiling(L_out, N, C_in, C_out, out_bytes, lane_tile, vmem_budget):
    """Pick the lane tile T (multiple of 128) and the number of lane tiles.

    Goals (perf review): (a) minimise padded columns, (b) keep >= 4 grid points
    so both v7x TensorCores get work, (c) otherwise prefer the largest T that
    fits the VMEM budget (fewer ~0.35us grid-step overheads, longer DMA rows).
    """
    # Per-lane-column VMEM bytes: double-buffered xc tile + double-buffered
    # output tile + in-kernel f32 temporaries.  Weights/bias are T-independent.
    per_col = (2 * (2 * C_in) * 2        # xc (ev+od streams), 2 buffers, bf16
               + 2 * C_out * out_bytes   # output tile, 2 buffers
               + 2 * C_in * 4            # f32 rolled-od / tap0 temporaries
               + C_out * 4)              # f32 accumulator
    fixed = 2 * (3 * C_out * C_in * 2) + 2 * C_out * 4 + (1 << 14)
    t_cap = max(vmem_budget - fixed, 0) // per_col
    t_cap = min(t_cap, lane_tile, _round_up(L_out, 128))
    t_cap = max(128, t_cap // 128 * 128)

    cands = []
    for t in range(128, t_cap + 1, 128):
        nt = _cdiv(L_out, t)
        cands.append((nt * t, nt, t))
    min_lp = min(c[0] for c in cands)
    slack = min_lp // 32                       # allow <= ~3% extra padded work
    ok = [c for c in cands if c[0] <= min_lp + slack]
    par = [c for c in ok if N * c[1] >= 4]     # enough grid points for 2 TCs
    pool = par if par else ok
    lp, nt, t = max(pool, key=lambda c: c[2])  # then largest lane tile
    return t, nt, lp


# ------------------------------ wrapper ----------------------------------------

def downsample1d(x, *, with_conv, weight=None, bias=None, lane_tile=1024,
                 compute_dtype=jnp.bfloat16, out_dtype=None):
    """Forward pass of Downsample1D. x: (N, C, L) in NCL layout."""
    N, C, L = x.shape

    if not with_conv:
        # F.avg_pool1d(kernel_size=2, stride=2): one fused XLA pass is optimal
        # (read L, write L/2); a Pallas kernel would only add HBM traffic.
        L_out = L // 2
        return (x[:, :, 0:2 * L_out:2] + x[:, :, 1:2 * L_out:2]) * 0.5

    assert weight is not None and bias is not None
    C_out, C_in, K = weight.shape
    assert C_in == C and K == 3, (weight.shape, x.shape)
    out_dtype = x.dtype if out_dtype is None else out_dtype
    out_bytes = jnp.dtype(out_dtype).itemsize

    L_out = L // 2 + 1                     # right-pad 1 + conv(k=3, s=2, p=1)

    # ---- generation-aware tiling / VMEM budget -------------------------------
    vmem_cap = _vmem_capacity_bytes()      # 128 MiB v5e/v6e, 64 MiB v7x (per TC)
    vmem_limit = vmem_cap * 3 // 4         # ~96 MiB / ~48 MiB
    T, num_tiles, L_out_p = _select_tiling(
        L_out, N, C_in, C_out, out_bytes, lane_tile, vmem_limit * 7 // 10)

    # ---- host-side glue: one fused XLA pass builds the 2-stream input --------
    # Conv taps in terms of the original x:
    #   tap0[t] = x[2t-1],  tap1[t] = x[2t] (= ev),  tap2[t] = x[2t+1] (= od)
    # tap0 is rebuilt in-kernel from the odd stream (lane rotate + halo).
    xb = x.astype(compute_dtype)

    def rpad(a):
        return jnp.pad(a, ((0, 0), (0, 0), (0, L_out_p - a.shape[-1])))

    x_ev = rpad(xb[:, :, 0::2])                            # x[2t]
    x_od = rpad(xb[:, :, 1::2])                            # x[2t+1]
    xc = jnp.stack([x_ev, x_od], axis=1)                   # (N, 2, C, L_out_p)

    if num_tiles > 1:
        halo_cols = x_od[:, :, T - 1:L_out_p - 1:T]        # x_od[j*T - 1], j>=1
        halo = jnp.concatenate(
            [jnp.zeros((N, C, 1), compute_dtype), halo_cols], axis=2)
    else:
        halo = jnp.zeros((N, C, 1), compute_dtype)
    halo = jnp.transpose(halo, (0, 2, 1))[:, :, :, None]   # (N, nt, C, 1)

    # Per-tap weights (3, C_out, C_in): w3[k, o, c] = weight[o, c, k]
    w3 = jnp.transpose(weight, (2, 0, 1)).astype(compute_dtype)
    b2 = bias.reshape(C_out, 1).astype(jnp.float32)

    shift = _right_shift_amount(T)

    def conv_kernel(xc_ref, halo_ref, w_ref, b_ref, o_ref):
        # xc_ref  : (2, C_in, T)     bf16 — [even, odd] input streams
        # halo_ref: (C_in, 1)        bf16 — x_od column just left of this tile
        # w_ref   : (3, C_out, C_in) bf16 — per-tap weights (VMEM-resident)
        # b_ref   : (C_out, 1)       f32
        # o_ref   : (C_out, T)
        ev = xc_ref[0]
        od = xc_ref[1]
        # tap0[t] = x[2t-1] = od[t-1]: lane rotate (XLU, hidden under MXU/DMA),
        # column 0 patched with the halo column.
        od_prev = pltpu.roll(od.astype(jnp.float32), shift, 1)
        col = jax.lax.broadcasted_iota(jnp.int32, od_prev.shape, 1)
        tap0 = jnp.where(col == 0, halo_ref[...].astype(jnp.float32),
                         od_prev).astype(od.dtype)
        # Three back-to-back K=C_in MXU contractions against VMEM-resident
        # weights == the fused K=3*C_in matmul (same MXU work, no in-kernel
        # sublane concat/relayout of a tap matrix).
        acc = jnp.dot(w_ref[1], ev, preferred_element_type=jnp.float32)
        acc += jnp.dot(w_ref[2], od, preferred_element_type=jnp.float32)
        acc += jnp.dot(w_ref[0], tap0, preferred_element_type=jnp.float32)
        o_ref[...] = (acc + b_ref[...]).astype(o_ref.dtype)   # f32 epilogue

    itemsize_c = jnp.dtype(compute_dtype).itemsize
    cost = pl.CostEstimate(
        flops=int(2 * N * L_out_p * 3 * C_in * C_out),
        transcendentals=0,
        bytes_accessed=int(xc.size * itemsize_c + halo.size * itemsize_c
                           + w3.size * itemsize_c + b2.size * 4
                           + N * C_out * L_out_p * out_bytes),
    )

    y_p = pl.pallas_call(
        conv_kernel,
        out_shape=jax.ShapeDtypeStruct((N, C_out, L_out_p), out_dtype),
        grid_spec=pltpu.PrefetchScalarGridSpec(
            num_scalar_prefetch=0,
            grid=(N, num_tiles),
            in_specs=[
                pl.BlockSpec((pl.Squeezed(), 2, C_in, T),
                             lambda n, j: (n, 0, 0, j)),
                pl.BlockSpec((pl.Squeezed(), pl.Squeezed(), C_in, 1),
                             lambda n, j: (n, j, 0, 0)),
                pl.BlockSpec((3, C_out, C_in), lambda n, j: (0, 0, 0)),
                pl.BlockSpec((C_out, 1), lambda n, j: (0, 0)),
            ],
            out_specs=pl.BlockSpec((pl.Squeezed(), C_out, T),
                                   lambda n, j: (n, 0, j)),
        ),
        compiler_params=pltpu.CompilerParams(
            dimension_semantics=("parallel", "parallel"),
            vmem_limit_bytes=int(vmem_limit),
        ),
        cost_estimate=cost,
    )(xc, halo, w3, b2)

    return y_p[:, :, :L_out]   # drop the lane-dense padding columns


# -------------------------------- main ------------------------------------------

if __name__ == "__main__":
    key = jax.random.PRNGKey(0)
    HIGHEST = jax.lax.Precision.HIGHEST

    def conv_ref(x, w, b):
        n, c, l = x.shape
        l_out = l // 2 + 1
        xp = jnp.pad(x, ((0, 0), (0, 0), (1, 2)))
        cols = jnp.stack(
            [xp[:, :, k:k + 2 * l_out - 1:2] for k in range(3)], axis=1)
        return (jnp.einsum('nkct,ock->not', cols, w, precision=HIGHEST)
                + b[None, :, None])

    def check_conv(kx, kw, kb, N, C, L):
        fan_in = C * 3
        bound = 1.0 / (fan_in ** 0.5)
        x = jax.random.normal(kx, (N, C, L), jnp.float32)
        w = jax.random.uniform(kw, (C, C, 3), jnp.float32, -bound, bound)
        b = jax.random.uniform(kb, (C,), jnp.float32, -bound, bound)
        y = jax.block_until_ready(
            downsample1d(x, with_conv=True, weight=w, bias=b))
        assert y.shape == (N, C, L // 2 + 1), y.shape
        # tight check: bf16-quantised inputs, f32 accumulation (= MXU path)
        xq = x.astype(jnp.bfloat16).astype(jnp.float32)
        wq = w.astype(jnp.bfloat16).astype(jnp.float32)
        ref_q = conv_ref(xq, wq, b)
        assert jnp.allclose(y, ref_q, atol=1e-4, rtol=1e-4), \
            f"conv mismatch (bf16 ref) N={N} C={C} L={L}"
        # loose check against the full-f32 reference
        ref_f = conv_ref(x, w, b)
        assert jnp.allclose(y, ref_f, atol=6e-2, rtol=6e-2), \
            f"conv mismatch (f32 ref) N={N} C={C} L={L}"

    keys = jax.random.split(key, 7)

    # small single-tile case (module-typical toy shape)
    check_conv(keys[0], keys[1], keys[2], N=2, C=4, L=16)

    # multi-tile case: exercises the lane-tile boundary, the in-kernel halo /
    # rotate path and the padded-output slice-back (L_out=261 -> 3 x 128 tiles).
    check_conv(keys[3], keys[4], keys[5], N=2, C=8, L=520)

    # avg-pool path (with_conv=False)
    x = jax.random.normal(keys[6], (2, 4, 16), jnp.float32)
    y_pool = jax.block_until_ready(downsample1d(x, with_conv=False))
    ref_pool = (x[:, :, 0::2] + x[:, :, 1::2]) * 0.5
    assert y_pool.shape == (2, 4, 8), y_pool.shape
    assert jnp.allclose(y_pool, ref_pool, atol=1e-6, rtol=1e-6), "avgpool mismatch"

    print("KERNEL_OK")
</pallas_src>

<mosaic_0001>
module attributes {stable_mosaic.version = 11 : i64} {
  func.func @probe(%arg0: memref<8x128xf32, #tpu.memory_space<vmem>>, %arg1: memref<8x128xf32, #tpu.memory_space<vmem>>) attributes {dimension_semantics = [], scalar_prefetch = 0 : i64, scratch_operands = 0 : i64, tpu.core_type = #tpu.core_type<tc>} {
    %c0 = arith.constant 0 : index
    %c0_0 = arith.constant 0 : index
    %0 = vector.load %arg0[%c0, %c0_0] : memref<8x128xf32, #tpu.memory_space<vmem>>, vector<8x128xf32>
    %c1_i32 = arith.constant 1 : i32
    %1 = tpu.dynamic_rotate %0 by %c1_i32 dim 1 : vector<8x128xf32>, i32 -> vector<8x128xf32>
    %c0_1 = arith.constant 0 : index
    %c0_2 = arith.constant 0 : index
    %2 = vector.load %arg1[%c0_1, %c0_2] : memref<8x128xf32, #tpu.memory_space<vmem>>, vector<8x128xf32>
    tpu.vector_store %arg1[%c0_1, %c0_2], %1 {strides = array<i32>} : memref<8x128xf32, #tpu.memory_space<vmem>>, vector<8x128xf32>,
    return
  }
}

</mosaic_0001>

<bundles_post_ra>
// kernel: tpu_custom_call.1
= control target key start
LH: loop header
LB: loop body
LE: loop exit
PB: predicated region body
PF: predicated region fallthrough
CT: control target
= control target key end

     0   :  { %6 = vsyncpa [#allocation3], 0  ;;  %s118_s0 = inlined_call_operand.hbm [shape: f32[8,128], index: 0, kind: input, shape index: {}]   ;;  %s119_s1 = inlined_call_operand.hbm [shape: f32[8,128], index: 1, kind: output, shape index: {}]  }
   0x1   :  { %7 = vsyncpa [#allocation4], 0  ;;  %s13_s8 = sshll.u32 %s118_s0, 4  ;;  %s99_s9 = smov [#allocation2]   ;;  %s14_s8 = int_to_ptr.hbm [resolvable:$true] %s13_s8 }
   0x2   :  { %s15_s10 = sshll.u32 %s99_s9, 4  ;;  %s16_s10 = int_to_ptr.vmem [resolvable:$true] %s15_s10 }
   0x3   :  { %18 = dma.hbm_to_vmem [thread:$0]  %s14_s8, 128, %s16_s10, [#allocation3]  }
   0x4   :  { %95 = dma.done.wait [#allocation3], 128  }
   0x5   :  { %96 = vsyncadd [#allocation3], 4294967168  ;;  %v23_v0 = vld [vmem:[#allocation2] sm:$0xff]  ;;  %s100_s11 = smov 1   ;;  %s101_s12 = smov [#allocation5]  }
   0x6   :  { %24 = vrot.lane.b32.xlu0 %v23_v0, %s100_s11  ;;  %s32_s13 = sshll.u32 %s101_s12, 4  ;;  %s34_s16 = sshll.u32 %s119_s1, 4  ;;  %s33_s13 = int_to_ptr.vmem [resolvable:$true] %s32_s13  ;;  %s35_s16 = int_to_ptr.hbm [resolvable:$true] %s34_s16 }
  0x78   :  { %v25_v1 = vpop.permute.xlu0 %24 }
  0x79   :  { %26 = vst [vmem:[#allocation5] sm:$0xff] %v25_v1 }
  0x7a   :  { %37 = dma.vmem_to_hbm [thread:$0]  %s33_s13, 128, %s35_s16, [#allocation4]  }
  0x7b   :  { %97 = dma.done.wait [#allocation4], 128  }
  0x7c   :  { %98 = vsyncadd [#allocation4], 4294967168 }
  0x7d   :  { %42 = vsyncpa [#allocation3], 1 }
  0x7e   :  { %43 = vsyncpa [#allocation4], 1 }

</bundles_post_ra>
